<compile_context>
chip_gen: v7x
topology: tpu7x:2x2x1
jax: 0.10.0
libtpu: 0.0.40
codegen_flags: <defaults>
</compile_context>

<pallas_src>
import jax
import jax.numpy as jnp
from jax.experimental import pallas as pl
from jax.experimental.pallas import tpu as pltpu

HEAD_LANES = 128     # lane-dense head/output width (4 real heads + zero pad)
_BLOCK_B = 256       # batch tile for the gridded (large-batch) path


def _round8(n):
    return ((n + 7) // 8) * 8


def make_actor_kernel(n_obs, hidden, r_w1, r_w2, r_wh, r_vec):
    """Kernel closure over static layout offsets of the parameter slab."""

    def actor_kernel(x_ref, slab_ref, o_ref):
        # Parameter slab layout (all rows 128 lanes wide, 8-row aligned):
        #   [r_w1 : r_w1+n_obs , :hidden] = W1
        #   [r_w2 : r_w2+hidden, :hidden] = W2
        #   [r_wh : r_wh+hidden, :      ] = stacked head weights (lanes 0..3)
        #   [r_vec+0] = b1, [r_vec+1] = b2, [r_vec+2] = bh,
        #   [r_vec+3] = output scale, [r_vec+4] = output offset.
        w1 = slab_ref[r_w1:r_w1 + n_obs, :hidden]
        w2 = slab_ref[r_w2:r_w2 + hidden, :hidden]
        wh = slab_ref[r_wh:r_wh + hidden, :]
        b1 = slab_ref[r_vec + 0:r_vec + 1, :hidden]
        b2 = slab_ref[r_vec + 1:r_vec + 2, :hidden]
        bh = slab_ref[r_vec + 2:r_vec + 3, :]
        smul = slab_ref[r_vec + 3:r_vec + 4, :]
        sadd = slab_ref[r_vec + 4:r_vec + 5, :]

        # Hidden layer 1: relu(x @ W1 + b1)
        h1 = jnp.dot(x_ref[...], w1, preferred_element_type=jnp.float32)
        h1 = jnp.maximum(h1 + b1, 0.0)
        # Hidden layer 2: relu(h1 @ W2 + b2)
        h2 = jnp.dot(h1, w2, preferred_element_type=jnp.float32)
        h2 = jnp.maximum(h2 + b2, 0.0)
        # 4 scalar heads stacked (zero-padded to 128 lanes), then tanh.
        t = jnp.tanh(jnp.dot(h2, wh, preferred_element_type=jnp.float32) + bh)
        # Per-lane affine fold of (0.5*t+0.5)*c == t*(c/2)+(c/2)  and  t*50.
        # Padded lanes have smul = sadd = 0 -> exact zeros (lane-dense store).
        o_ref[...] = t * smul + sadd

    return actor_kernel


def actor_forward(x, params, *, block_b=_BLOCK_B):
    """x: [B, n_obs] float32. Returns [B, 4] (or [4] if B == 1, like squeeze(0))."""
    slab, meta = params
    B, n_obs = x.shape
    assert n_obs == meta["n_obs"]
    rows = slab.shape[0]
    kernel = make_actor_kernel(meta["n_obs"], meta["hidden"],
                               meta["r_w1"], meta["r_w2"], meta["r_wh"], meta["r_vec"])

    if B > block_b and B % block_b == 0:
        # Large-batch path: tile the batch, keep the parameter slab resident,
        # mark the batch axis parallel (megacore sharding on v7x).
        full = pl.pallas_call(
            kernel,
            out_shape=jax.ShapeDtypeStruct((B, HEAD_LANES), jnp.float32),
            grid_spec=pltpu.PrefetchScalarGridSpec(
                num_scalar_prefetch=0,
                grid=(B // block_b,),
                in_specs=[
                    pl.BlockSpec((block_b, n_obs), lambda i: (i, 0)),
                    pl.BlockSpec((rows, HEAD_LANES), lambda i: (0, 0)),
                ],
                out_specs=pl.BlockSpec((block_b, HEAD_LANES), lambda i: (i, 0)),
            ),
            compiler_params=pltpu.CompilerParams(
                dimension_semantics=("parallel",)),
        )(x, slab)
    else:
        # Whole-problem-in-VMEM path: no grid, minimal launch/DMA overhead.
        full = pl.pallas_call(
            kernel,
            out_shape=jax.ShapeDtypeStruct((B, HEAD_LANES), jnp.float32),
            in_specs=[pl.BlockSpec(memory_space=pltpu.MemorySpace.VMEM)] * 2,
            out_specs=pl.BlockSpec(memory_space=pltpu.MemorySpace.VMEM),
        )(x, slab)

    out = full[:, :4]            # drop the lane padding (heads live in lanes 0..3)
    # torch .squeeze(0): only removes dim 0 if it is size 1
    return out[0] if B == 1 else out


def init_params(key, n_obs, hidden_size, init_w=0.003):
    assert hidden_size <= HEAD_LANES, "slab layout assumes hidden_size <= 128"
    assert n_obs <= HEAD_LANES, "slab layout assumes n_obs <= 128"
    ks = jax.random.split(key, 6)
    # PyTorch nn.Linear default init: U(-1/sqrt(fan_in), 1/sqrt(fan_in))
    lim1 = 1.0 / (float(n_obs) ** 0.5)
    lim2 = 1.0 / (float(hidden_size) ** 0.5)
    w1 = jax.random.uniform(ks[0], (n_obs, hidden_size), jnp.float32, -lim1, lim1)
    b1 = jax.random.uniform(ks[1], (hidden_size,), jnp.float32, -lim1, lim1)
    w2 = jax.random.uniform(ks[2], (hidden_size, hidden_size), jnp.float32, -lim2, lim2)
    b2 = jax.random.uniform(ks[3], (hidden_size,), jnp.float32, -lim2, lim2)
    # Heads linear3..linear6: U(-init_w, init_w), stacked as [hidden, 4]
    wh = jax.random.uniform(ks[4], (hidden_size, 4), jnp.float32, -init_w, init_w)
    bh = jax.random.uniform(ks[5], (4,), jnp.float32, -init_w, init_w)

    # Folded output affine: (0.5*t+0.5)*c == t*(c/2) + c/2 ; head 4: t*50 + 0.
    smul = jnp.array([60.5, 15.0, 10.0, 50.0], jnp.float32)
    sadd = jnp.array([60.5, 15.0, 10.0, 0.0], jnp.float32)

    # Build the single parameter slab (one DMA for every weight & vector).
    r_w1 = 0
    r_w2 = r_w1 + _round8(n_obs)
    r_wh = r_w2 + _round8(hidden_size)
    r_vec = r_wh + _round8(hidden_size)
    rows = r_vec + 8
    slab = jnp.zeros((rows, HEAD_LANES), jnp.float32)
    slab = slab.at[r_w1:r_w1 + n_obs, :hidden_size].set(w1)
    slab = slab.at[r_w2:r_w2 + hidden_size, :hidden_size].set(w2)
    slab = slab.at[r_wh:r_wh + hidden_size, :4].set(wh)
    slab = slab.at[r_vec + 0, :hidden_size].set(b1)
    slab = slab.at[r_vec + 1, :hidden_size].set(b2)
    slab = slab.at[r_vec + 2, :4].set(bh)
    slab = slab.at[r_vec + 3, :4].set(smul)
    slab = slab.at[r_vec + 4, :4].set(sadd)

    meta = dict(n_obs=n_obs, hidden=hidden_size,
                r_w1=r_w1, r_w2=r_w2, r_wh=r_wh, r_vec=r_vec)
    return (slab, meta)


def actor_ref(x, params):
    """Pure-JAX reference for correctness checking."""
    slab, meta = params
    n, H = meta["n_obs"], meta["hidden"]
    w1 = slab[meta["r_w1"]:meta["r_w1"] + n, :H]
    w2 = slab[meta["r_w2"]:meta["r_w2"] + H, :H]
    wh = slab[meta["r_wh"]:meta["r_wh"] + H, :4]
    b1 = slab[meta["r_vec"] + 0, :H]
    b2 = slab[meta["r_vec"] + 1, :H]
    bh = slab[meta["r_vec"] + 2, :4]
    smul = slab[meta["r_vec"] + 3, :4]
    sadd = slab[meta["r_vec"] + 4, :4]
    h1 = jnp.maximum(x @ w1 + b1, 0.0)
    h2 = jnp.maximum(h1 @ w2 + b2, 0.0)
    t = jnp.tanh(h2 @ wh + bh)
    out = t * smul + sadd
    return out[0] if x.shape[0] == 1 else out


if __name__ == "__main__":
    key = jax.random.PRNGKey(0)
    kx, kp, kb = jax.random.split(key, 3)

    n_obs, hidden_size = 8, 32
    params = init_params(kp, n_obs, hidden_size)

    # Small batch: single-block (whole-in-VMEM) path.
    x_small = jax.random.normal(kx, (2, n_obs), jnp.float32)
    out_small = jax.block_until_ready(actor_forward(x_small, params))
    ref_small = actor_ref(x_small, params)
    assert out_small.shape == (2, 4), out_small.shape
    assert jnp.allclose(out_small, ref_small, atol=1e-4, rtol=1e-5), (out_small, ref_small)

    # Batch of 1: squeeze(0) behaviour.
    x_one = jax.random.normal(kb, (1, n_obs), jnp.float32)
    out_one = jax.block_until_ready(actor_forward(x_one, params))
    assert out_one.shape == (4,), out_one.shape
    assert jnp.allclose(out_one, actor_ref(x_one, params), atol=1e-4, rtol=1e-5)

    # Larger batch: batch-tiled grid path (parallel batch axis, resident slab).
    x_big = jax.random.normal(kb, (512, n_obs), jnp.float32)
    out_big = jax.block_until_ready(actor_forward(x_big, params))
    ref_big = actor_ref(x_big, params)
    assert out_big.shape == (512, 4), out_big.shape
    assert jnp.allclose(out_big, ref_big, atol=1e-4, rtol=1e-5), (out_big, ref_big)

    print("KERNEL_OK")
</pallas_src>

<mosaic_0001>
module attributes {stable_mosaic.version = 11 : i64} {
  func.func @actor_kernel(%arg0: memref<2x8xf32, #tpu.memory_space<vmem>>, %arg1: memref<80x128xf32, #tpu.memory_space<vmem>>, %arg2: memref<2x128xf32, #tpu.memory_space<vmem>>) attributes {dimension_semantics = [], scalar_prefetch = 0 : i64, scratch_operands = 0 : i64, tpu.core_type = #tpu.core_type<tc>} {
    %c0 = arith.constant 0 : index
    %c0_0 = arith.constant 0 : index
    %0 = vector.load %arg1[%c0, %c0_0] : memref<80x128xf32, #tpu.memory_space<vmem>>, vector<8x32xf32>
    %c8 = arith.constant 8 : index
    %c0_1 = arith.constant 0 : index
    %1 = vector.load %arg1[%c8, %c0_1] : memref<80x128xf32, #tpu.memory_space<vmem>>, vector<32x32xf32>
    %c40 = arith.constant 40 : index
    %c0_2 = arith.constant 0 : index
    %2 = vector.load %arg1[%c40, %c0_2] : memref<80x128xf32, #tpu.memory_space<vmem>>, vector<32x128xf32>
    %c72 = arith.constant 72 : index
    %c0_3 = arith.constant 0 : index
    %3 = vector.load %arg1[%c72, %c0_3] : memref<80x128xf32, #tpu.memory_space<vmem>>, vector<1x32xf32>
    %c73 = arith.constant 73 : index
    %c0_4 = arith.constant 0 : index
    %4 = vector.load %arg1[%c73, %c0_4] : memref<80x128xf32, #tpu.memory_space<vmem>>, vector<1x32xf32>
    %c74 = arith.constant 74 : index
    %c0_5 = arith.constant 0 : index
    %5 = vector.load %arg1[%c74, %c0_5] : memref<80x128xf32, #tpu.memory_space<vmem>>, vector<1x128xf32>
    %c75 = arith.constant 75 : index
    %c0_6 = arith.constant 0 : index
    %6 = vector.load %arg1[%c75, %c0_6] : memref<80x128xf32, #tpu.memory_space<vmem>>, vector<1x128xf32>
    %c76 = arith.constant 76 : index
    %c0_7 = arith.constant 0 : index
    %7 = vector.load %arg1[%c76, %c0_7] : memref<80x128xf32, #tpu.memory_space<vmem>>, vector<1x128xf32>
    %c0_8 = arith.constant 0 : index
    %c0_9 = arith.constant 0 : index
    %8 = vector.load %arg0[%c0_8, %c0_9] : memref<2x8xf32, #tpu.memory_space<vmem>>, vector<2x8xf32>
    %cst = arith.constant dense<0.000000e+00> : vector<2x32xf32>
    %9 = tpu.matmul %8, %0, %cst {dimension_numbers = #tpu.dot_dimension_numbers<[1], [0], [0], [1], [0, 0, 1, 1], [], []>} : vector<2x8xf32>, vector<8x32xf32>, vector<2x32xf32> -> vector<2x32xf32>
    %10 = vector.broadcast %3 : vector<1x32xf32> to vector<2x32xf32>
    %11 = arith.addf %9, %10 : vector<2x32xf32>
    %cst_10 = arith.constant 0.000000e+00 : f32
    %12 = vector.broadcast %cst_10 : f32 to vector<2x32xf32>
    %13 = arith.maximumf %11, %12 : vector<2x32xf32>
    %cst_11 = arith.constant dense<0.000000e+00> : vector<2x32xf32>
    %14 = tpu.matmul %13, %1, %cst_11 {dimension_numbers = #tpu.dot_dimension_numbers<[1], [0], [0], [1], [0, 0, 1, 1], [], []>} : vector<2x32xf32>, vector<32x32xf32>, vector<2x32xf32> -> vector<2x32xf32>
    %15 = vector.broadcast %4 : vector<1x32xf32> to vector<2x32xf32>
    %16 = arith.addf %14, %15 : vector<2x32xf32>
    %cst_12 = arith.constant 0.000000e+00 : f32
    %17 = vector.broadcast %cst_12 : f32 to vector<2x32xf32>
    %18 = arith.maximumf %16, %17 : vector<2x32xf32>
    %cst_13 = arith.constant dense<0.000000e+00> : vector<2x128xf32>
    %19 = tpu.matmul %18, %2, %cst_13 {dimension_numbers = #tpu.dot_dimension_numbers<[1], [0], [0], [1], [0, 0, 1, 1], [], []>} : vector<2x32xf32>, vector<32x128xf32>, vector<2x128xf32> -> vector<2x128xf32>
    %20 = vector.broadcast %5 : vector<1x128xf32> to vector<2x128xf32>
    %21 = arith.addf %19, %20 : vector<2x128xf32>
    %22 = math.tanh %21 : vector<2x128xf32>
    %23 = vector.broadcast %6 : vector<1x128xf32> to vector<2x128xf32>
    %24 = arith.mulf %22, %23 : vector<2x128xf32>
    %25 = vector.broadcast %7 : vector<1x128xf32> to vector<2x128xf32>
    %26 = arith.addf %24, %25 : vector<2x128xf32>
    %c0_14 = arith.constant 0 : index
    %c0_15 = arith.constant 0 : index
    %27 = vector.load %arg2[%c0_14, %c0_15] : memref<2x128xf32, #tpu.memory_space<vmem>>, vector<2x128xf32>
    tpu.vector_store %arg2[%c0_14, %c0_15], %26 {strides = array<i32>} : memref<2x128xf32, #tpu.memory_space<vmem>>, vector<2x128xf32>,
    return
  }
}

</mosaic_0001>

<bundles_post_ra>
// kernel: tpu_custom_call.1
= control target key start
LH: loop header
LB: loop body
LE: loop exit
PB: predicated region body
PF: predicated region fallthrough
CT: control target
= control target key end

     0   :  { %7 = vsyncpa [#allocation3], 0  ;;  %s523_s0 = inlined_call_operand.hbm [shape: f32[2,8], index: 0, kind: input, shape index: {}]   ;;  %s524_s1 = inlined_call_operand.hbm [shape: f32[80,128], index: 1, kind: input, shape index: {}]   ;;  %s525_s2 = inlined_call_operand.hbm [shape: f32[2,128], index: 2, kind: output, shape index: {}]  }
   0x1   :  { %8 = vsyncpa [#allocation6], 0 }
   0x2   :  { %9 = vsyncpa [#allocation4], 0  ;;  %s457_s9 = smov [#allocation2]   ;;  %s458_s11 = smov [#allocation5]  }
   0x3   :  { %s16_s10 = sshll.u32 %s457_s9, 4  ;;  %s25_s12 = sshll.u32 %s458_s11, 4  ;;  %s17_s10 = int_to_ptr.vmem [resolvable:$true] %s16_s10  ;;  %s480_s12 = int_to_ptr.vmem [resolvable:$true] %s25_s12 }
   0x4   :  { %s385_s15 = scalar_lea.hbm %s523_s0, 32 }
   0x5   :  { %p386_p0 = scmp.ne.s32.totalorder %s523_s0, %s385_s15  ;;  %p389_p1 = scmp.lt.u32.totalorder %s385_s15, %s523_s0 }
   0x7   :  { %p391_p2 = pnand %p389_p1, %p386_p0 }
   0x9   :  { %394 = shalt.err (!%p391_p2)
}
   0xa   :  { %s395_s20 = scalar_lea.vmem %s17_s10, 32  ;;  %p400_p4 = scmp.lt.s32.totalorder %s17_s10, %s17_s10 }
   0xb   :  { %p396_p3 = scmp.ne.s32.totalorder %s17_s10, %s395_s20  ;;  %p401_p5 = scmp.lt.s32.totalorder %s395_s20, %s395_s20 }
   0xd   :  { %p402_p6 = por %p401_p5, %p400_p4 }
   0xf   :  { %p403_p7 = pnand %p402_p6, %p396_p3 }
  0x11   :  { %406 = shalt.err (!%p403_p7)
}
  0x12   :  { %19 = dma.hbm_to_vmem [thread:$0]  %s523_s0, 32, %s17_s10, [#allocation3]  }
  0x13   :  { %s407_s25 = scalar_lea.hbm %s524_s1, 1280 }
  0x14   :  { %p408_p8 = scmp.ne.s32.totalorder %s524_s1, %s407_s25  ;;  %p411_p9 = scmp.lt.u32.totalorder %s407_s25, %s524_s1 }
  0x16   :  { %p413_p10 = pnand %p411_p9, %p408_p8 }
  0x18   :  { %416 = shalt.err (!%p413_p10)
}
  0x19   :  { %s417_s30 = scalar_lea.vmem %s480_s12, 1280  ;;  %p422_p12 = scmp.lt.s32.totalorder %s480_s12, %s480_s12 }
  0x1a   :  { %p418_p11 = scmp.ne.s32.totalorder %s480_s12, %s417_s30  ;;  %p423_p13 = scmp.lt.s32.totalorder %s417_s30, %s417_s30 }
  0x1c   :  { %p424_p0 = por %p423_p13, %p422_p12 }
  0x1e   :  { %p425_p1 = pnand %p424_p0, %p418_p11 }
  0x20   :  { %428 = shalt.err (!%p425_p1)
}
  0x21   :  { %s459_s0 = smov 128   ;;  %s460_s3 = smov 8  }
  0x22   :  { %31 = dma.hbm_to_vmem [thread:$0]  %s524_s1, 1280, %s480_s12, [#allocation6], %s459_s0, %s459_s0, %s460_s3  }
  0x23   :  { %451 = dma.done.wait [#allocation3], 32  }
  0x24   :  { %452 = vsyncadd [#allocation3], 4294967264 }
  0x25   :  { %453 = dma.done.wait [#allocation6], 1280  }
  0x26   :  { %454 = vsyncadd [#allocation6], 4294966016  ;;  %v461_v0 = vmov 0.0   ;;  %vm462_vm0 = vmmov 0   ;;  %v463_v1 = vmov 0.0|0.0   ;;  %vm57_vm1 = vcmask 64512  }
  0x27   :  { %336 = vmatprep.subr.mxu0 %v461_v0  ;;  %338 = vmatprep.mubr.msk.f32.mxu0 %vm462_vm0, %v461_v0  ;;  %v38_v2 = vld [vmem:[#allocation5] sm:$0xff]  ;;  %v52_v3 = vld [vmem:[#allocation2] sm:$0x3]  ;;  %v39_v4 = vld [vmem:[#allocation5 + $0x8] sm:$0xff]  ;;  %vm136_vm2 = vcmask 261120   ;;  %s464_s1 = smov [#allocation7]  }
  0x28   :  { %363 = vmatprep.subr.bf16.mxu1 %v463_v1  ;;  %349 = vmatprep.mubr.msk.f32.mxu1 %vm462_vm0, %v461_v0  ;;  %v40_v5 = vld [vmem:[#allocation5 + $0x10] sm:$0xff]  ;;  %v41_v7 = vld [vmem:[#allocation5 + $0x18] sm:$0xff]  ;;  %v42_v8 = vld [vmem:[#allocation5 + $0x20] sm:$0xff]  ;;  %s306_s6 = sshll.u32 %s464_s1, 4  ;;  %s307_s6 = int_to_ptr.vmem [resolvable:$true] %s306_s6 }
  0x29   :  { %337 = vmatpush3.msra.mxu0 %v38_v2  ;;  %v364_v6 = vpack.c.bf16 %v40_v5, %v39_v4  ;;  %v367_v9 = vpack.c.bf16 %v42_v8, %v41_v7  ;;  %v43_v10 = vld [vmem:[#allocation5 + $0x28] sm:$0xff]  ;;  %v44_v11 = vld [vmem:[#allocation5 + $0x30] sm:$0xff]  ;;  %v45_v18 = vld [vmem:[#allocation5 + $0x38] sm:$0xff]  ;;  %s429_s7 = scalar_lea.vmem %s307_s6, 32  ;;  %p434_p3 = scmp.lt.s32.totalorder %s307_s6, %s307_s6 }
  0x2a   :  { %339 = vmatmul.mubr.msk.f32.vlgmr.msra.gmra.mrb[0].mxu0 %vm57_vm1, %v52_v3  ;;  %369 = vmatprep.subr.bf16.mxu0 %v463_v1  ;;  %v370_v12 = vpack.c.bf16 %v44_v11, %v43_v10  ;;  %v316_v13 = vld [vmem:[#allocation5 + $0x48] ss:$0 sm:$0xff]  ;;  %v46_v19 = vld [vmem:[#allocation5 + $0x40] sm:$0xff]  ;;  %v318_v21 = vld [vmem:[#allocation5 + $0x49] ss:$0 sm:$0xff]  ;;  %p430_p2 = scmp.ne.s32.totalorder %s307_s6, %s429_s7  ;;  %p435_p4 = scmp.lt.s32.totalorder %s429_s7, %s429_s7 }
  0x2b   :  { %360 = vmatprep.mubr.msk.f32.mxu0 %vm462_vm0, %v461_v0  ;;  %365 = vmatpush3.bf16.msra.mxu1 %v364_v6  ;;  %v373_v20 = vpack.c.bf16 %v46_v19, %v45_v18  ;;  %v320_v26 = vld [vmem:[#allocation5 + $0x4a] ss:$0 sm:$0xff]  ;;  %v322_v30 = vld [vmem:[#allocation5 + $0x4b] ss:$0 sm:$0xff]  ;;  %v323_v32 = vld [vmem:[#allocation5 + $0x4c] ss:$0 sm:$0xff] }
  0x2c   :  { %366 = vmatprep.subr.bf16.mxu1 %v463_v1  ;;  %371 = vmatpush3.bf16.msra.mxu0 %v370_v12  ;;  %p436_p5 = por %p435_p4, %p434_p3 }
  0x2d   :  { %372 = vmatprep.subr.bf16.mxu0 %v463_v1 }
  0x2e   :  { %p437_p6 = pnand %p436_p5, %p430_p2 }
  0x2f   :  { %368 = vmatpush3.bf16.msra.mxu1 %v367_v9 }
  0x30   :  { %374 = vmatpush3.bf16.msra.mxu0 %v373_v20 }
  0xfd   :  { %v127_v14 = vpop.f32.mrb[0].mxu0 }
  0xfe   :  { %v128_v15 = vadd.f32 %v316_v13, %v127_v14  ;;  %v340_v16 = vpop.f32.mrb[1].mxu0 }
 0x100   :  { %v131_v17 = vmax.f32 %v128_v15, 0.0 }
 0x102   :  { %350 = vmatmul.mubr.msk.f32.vlgmr.msra.gmra.mrb[0].mxu1 %vm136_vm2, %v131_v17 }
 0x1d5   :  { %v206_v22 = vpop.f32.mrb[0].mxu1 }
 0x1d6   :  { %v207_v23 = vadd.f32 %v318_v21, %v206_v22  ;;  %v351_v24 = vpop.f32.mrb[1].mxu1 }
 0x1d8   :  { %v210_v25 = vmax.f32 %v207_v23, 0.0 }
 0x1da   :  { %361 = vmatmul.mubr.msk.f32.vlgmr.msra.gmra.mrb[2].mxu0 %vm136_vm2, %v210_v25 }
 0x2ad   :  { %v284_v27 = vpop.f32.mrb[2].mxu0 }
 0x2ae   :  { %v285_v28 = vadd.f32 %v320_v26, %v284_v27  ;;  %v362_v29 = vpop.f32.mrb[3].mxu0 }
 0x2b0   :  { %383 = vtanh.f32 %v285_v28 }
 0x2ba   :  { %v384_v31 = vpop.eup %383 }
 0x2bb   :  { %v293_v33 = vmul.f32 %v384_v31, %v322_v30 }
 0x2bd   :  { %v298_v34 = vadd.f32 %v323_v32, %v293_v33 }
 0x2bf   :  { %299 = vst [vmem:[#allocation7] sm:$0x3] %v298_v34 }
 0x2c0   :  { %440 = shalt.err (!%p437_p6)
}
 0x2c1   :  { %s441_s10 = scalar_lea.hbm %s525_s2, 32 }
 0x2c2   :  { %p442_p7 = scmp.ne.s32.totalorder %s525_s2, %s441_s10  ;;  %p445_p8 = scmp.lt.u32.totalorder %s441_s10, %s525_s2 }
 0x2c4   :  { %p447_p9 = pnand %p445_p8, %p442_p7 }
 0x2c6   :  { %450 = shalt.err (!%p447_p9)
}
 0x2c7   :  { %309 = dma.vmem_to_hbm [thread:$0]  %s307_s6, 32, %s525_s2, [#allocation4]  }
 0x2c8   :  { %455 = dma.done.wait [#allocation4], 32  }
 0x2c9   :  { %456 = vsyncadd [#allocation4], 4294967264 }
 0x2ca   :  { %313 = vsyncpa [#allocation3], 1 }
 0x2cb   :  { %314 = vsyncpa [#allocation6], 1 }
 0x2cc   :  { %315 = vsyncpa [#allocation4], 1 }

</bundles_post_ra>
